<compile_context>
chip_gen: v6e
topology: v6e:2x2x1
jax: 0.10.0
libtpu: 0.0.40
codegen_flags: <defaults>
</compile_context>

<pallas_src>
import functools
import math

import jax
import jax.numpy as jnp
from jax.experimental import pallas as pl
from jax.experimental.pallas import tpu as pltpu


def _mha_mean_kernel(
    x_ref,                      # (tb, S, D)
    wqkv_ref, bqkv_ref,         # (D, 3D), (1, 3D)  (Q part pre-scaled by 1/sqrt(hd))
    wo_ref, bo_ref,             # (D, D),  (1, D)
    out_ref,                    # (tb, D)
    *, num_heads, compute_dtype,
):
    tb, S, D = x_ref.shape
    hd = D // num_heads
    cdt = compute_dtype

    # Grid-invariant loads, hoisted once per grid step.
    wqkv = wqkv_ref[...].astype(cdt)
    bqkv = bqkv_ref[...]                       # f32
    wo = wo_ref[...].astype(cdt)
    bo = bo_ref[...]                           # f32

    # Fused Q/K/V projection: one big MXU matmul (bf16 operands, f32 accumulate).
    x2 = x_ref[...].reshape(tb * S, D).astype(cdt)
    qkv = jnp.dot(x2, wqkv, preferred_element_type=jnp.float32) + bqkv
    qkv = qkv.reshape(tb, S, 3 * D)
    q = qkv[:, :, 0:D].astype(cdt)             # already scaled by 1/sqrt(hd)
    k = qkv[:, :, D:2 * D].astype(cdt)
    v = qkv[:, :, 2 * D:3 * D]                 # stays f32 (only used elementwise now)

    inv_S = 1.0 / S
    out = jnp.zeros((tb, D), jnp.float32)

    # Static unrolled loop over the 4 heads.
    for h in range(num_heads):
        lo, hi = h * hd, (h + 1) * hd
        qh = q[:, :, lo:hi]                    # (tb, S, hd) bf16
        kh = k[:, :, lo:hi]
        vh = v[:, :, lo:hi]                    # f32

        # Attention scores (MXU, f32 accumulation) + stable exp.
        s = jnp.einsum('bqd,bkd->bqk', qh, kh,
                       preferred_element_type=jnp.float32)       # (tb, S, S)
        s = s - jnp.max(s, axis=-1, keepdims=True)
        p = jnp.exp(s)                                           # f32
        l = jnp.sum(p, axis=-1, keepdims=True)                   # (tb, S, 1)

        # Normalization + mean over queries, commuted through P@V:
        #   mean_q(softmax(S) @ V) = (mean_q softmax(S)) @ V
        # rinv carries both the softmax denominator and the 1/S of the mean.
        rinv = pl.reciprocal(l, approx=True) * inv_S             # (tb, S, 1)
        pbar = jnp.sum(p * rinv, axis=1)                         # (tb, S)
        ctx_h = jnp.sum(pbar[:, :, None] * vh, axis=1)           # (tb, hd)

        # mean over seq also commutes with the linear out-projection.
        out = out + jnp.dot(ctx_h.astype(cdt), wo[lo:hi, :],
                            preferred_element_type=jnp.float32)

    out_ref[...] = (out + bo).astype(out_ref.dtype)


def _vmem_limit_bytes():
    """Scoped-VMEM budget derived from actual chip capacity (fallback 64 MiB)."""
    cap = 64 * 1024 * 1024
    try:
        info = pltpu.get_tpu_info()
        cap = int(getattr(info, "vmem_capacity_bytes", cap))
    except Exception:
        pass
    # Leave ~25% headroom for Mosaic internal scratch.
    return max(32 * 1024 * 1024, (cap * 3) // 4)


def _per_step_bytes(tb, S, D):
    # Rough live-bytes estimate per grid step:
    #   x tile (double-buffered f32) + x2/qkv/q/k/v copies ~ 26*tb*S*D
    #   scores s + exp(s) in f32                          ~ 8*tb*S*S
    #   out tile (double-buffered f32)                    ~ 8*tb*D
    return 26 * tb * S * D + 8 * tb * S * S + 8 * tb * D


def _weight_bytes(D):
    # double-buffered f32 HBM->VMEM copies + in-kernel bf16 casts
    return 2 * 4 * (3 * D * D + 3 * D + D * D + D) + 2 * (4 * D * D)


def _pick_tb(B, S, D, budget_bytes):
    """Largest batch tile that is a multiple of 8, divides B, keeps >= 2 grid
    steps when B allows it, and fits the rough VMEM budget."""
    fixed = _weight_bytes(D)

    def fits(tb):
        return fixed + _per_step_bytes(tb, S, D) <= budget_bytes

    cands = [t for t in range(8, B // 2 + 1, 8) if B % t == 0]
    if cands:
        for t in sorted(cands, reverse=True):
            if fits(t):
                return t
        return min(cands)   # nothing fits the rough budget; smallest legal tile
    # Tiny batch (or no multiple-of-8 divisor with >= 2 steps): whole batch.
    return B


def cross_attention(x, params, *, num_heads=4, tb=None, vmem_limit_bytes=None,
                    compute_dtype=jnp.bfloat16):
    """x: (B, S, D) -> (B, D).  Matches CrossAttention.forward (eval mode)."""
    B, S, D = x.shape
    assert D % num_heads == 0
    hd = D // num_heads
    scale = 1.0 / math.sqrt(hd)

    # Fold the 1/sqrt(hd) query scale into the Q projection and fuse Q/K/V into
    # a single (D, 3D) weight / (1, 3D) bias (one MXU pass over x per tile).
    w_qkv = jnp.concatenate([params["wq"] * scale, params["wk"], params["wv"]],
                            axis=1)
    b_qkv = jnp.concatenate([params["bq"] * scale, params["bk"], params["bv"]],
                            axis=1)

    if vmem_limit_bytes is None:
        vmem_limit_bytes = _vmem_limit_bytes()
    if tb is None:
        tb = _pick_tb(B, S, D, (vmem_limit_bytes * 9) // 10)
    assert B % tb == 0 and (tb % 8 == 0 or tb == B)
    grid = (B // tb,)

    full = lambda shape: pl.BlockSpec(shape, lambda i: (0,) * len(shape))

    kernel = functools.partial(_mha_mean_kernel, num_heads=num_heads,
                               compute_dtype=compute_dtype)
    return pl.pallas_call(
        kernel,
        out_shape=jax.ShapeDtypeStruct((B, D), x.dtype),
        grid_spec=pl.GridSpec(
            grid=grid,
            in_specs=[
                pl.BlockSpec((tb, S, D), lambda i: (i, 0, 0)),   # x, tiled over batch
                full((D, 3 * D)), full((1, 3 * D)),              # fused qkv proj
                full((D, D)), full((1, D)),                      # out proj
            ],
            out_specs=pl.BlockSpec((tb, D), lambda i: (i, 0)),
        ),
        compiler_params=pltpu.CompilerParams(
            dimension_semantics=("parallel",),
            vmem_limit_bytes=int(vmem_limit_bytes),
        ),
    )(x, w_qkv, b_qkv, params["wo"], params["bo"])


def init_params(key, dim):
    ks = jax.random.split(key, 4)
    bound = 1.0 / float(math.sqrt(dim))

    def lin(k):
        kw, kb = jax.random.split(k)
        w = jax.random.uniform(kw, (dim, dim), jnp.float32, -bound, bound)
        b = jax.random.uniform(kb, (1, dim), jnp.float32, -bound, bound)
        return w, b

    wq, bq = lin(ks[0])
    wk, bk = lin(ks[1])
    wv, bv = lin(ks[2])
    wo, bo = lin(ks[3])
    return dict(wq=wq, bq=bq, wk=wk, bk=bk, wv=wv, bv=bv, wo=wo, bo=bo)


def reference(x, p, num_heads=4):
    """Pure-JAX f32 reference mirroring torch.nn.MultiheadAttention self-attention
    (batch_first, dropout=0, eval) followed by mean over the seq dim."""
    B, S, D = x.shape
    hd = D // num_heads
    hp = jax.lax.Precision.HIGHEST

    q = jnp.matmul(x, p["wq"], precision=hp) + p["bq"]
    k = jnp.matmul(x, p["wk"], precision=hp) + p["bk"]
    v = jnp.matmul(x, p["wv"], precision=hp) + p["bv"]

    def split(t):
        return t.reshape(B, S, num_heads, hd).transpose(0, 2, 1, 3)  # (B,H,S,hd)

    qh, kh, vh = split(q), split(k), split(v)
    s = jnp.einsum('bhqd,bhkd->bhqk', qh, kh, precision=hp) / jnp.sqrt(hd)
    a = jax.nn.softmax(s, axis=-1)
    ctx = jnp.einsum('bhqk,bhkd->bhqd', a, vh, precision=hp)
    ctx = ctx.transpose(0, 2, 1, 3).reshape(B, S, D)
    out = jnp.matmul(ctx, p["wo"], precision=hp) + p["bo"]
    return out.mean(axis=1)


if __name__ == "__main__":
    H = 4
    key = jax.random.PRNGKey(0)
    kx, kp, kx2 = jax.random.split(key, 3)

    # Small shapes consistent with the module's forward: (batch, seq, dim).
    B, S, D = 2, 8, 32
    x = jax.random.normal(kx, (B, S, D), jnp.float32)
    params = init_params(kp, D)

    out = cross_attention(x, params, num_heads=H)
    out = jax.block_until_ready(out)
    assert out.shape == (B, D)
    ref = reference(x, params, num_heads=H)
    # bf16 matmul operands + approx reciprocal -> looser tolerance than pure f32.
    assert jnp.allclose(out, ref, atol=2e-2, rtol=2e-2), (
        f"mismatch vs reference, max |err|={jnp.max(jnp.abs(out - ref))}")

    # Second config exercising a multi-step batch grid (tb=8, grid=(2,)).
    B2 = 16
    x2 = jax.random.normal(kx2, (B2, S, D), jnp.float32)
    out2 = jax.block_until_ready(cross_attention(x2, params, num_heads=H))
    ref2 = reference(x2, params, num_heads=H)
    assert out2.shape == (B2, D)
    assert jnp.allclose(out2, ref2, atol=2e-2, rtol=2e-2), (
        f"tiled mismatch vs reference, max |err|={jnp.max(jnp.abs(out2 - ref2))}")

    print("KERNEL_OK")
</pallas_src>

<mosaic_0001>
module attributes {stable_mosaic.version = 11 : i64} {
  func.func @_mha_mean_kernel(%arg0: i32, %arg1: memref<2x8x32xf32, #tpu.memory_space<vmem>>, %arg2: memref<32x96xf32, #tpu.memory_space<vmem>>, %arg3: memref<1x96xf32, #tpu.memory_space<vmem>>, %arg4: memref<32x32xf32, #tpu.memory_space<vmem>>, %arg5: memref<1x32xf32, #tpu.memory_space<vmem>>, %arg6: memref<2x32xf32, #tpu.memory_space<vmem>>) attributes {dimension_semantics = [#tpu.dimension_semantics<parallel>], iteration_bounds = array<i64: 1>, scalar_prefetch = 0 : i64, scratch_operands = 0 : i64, tpu.core_type = #tpu.core_type<tc>, window_params = [{transform_indices = @transform_0, window_bounds = array<i64: 2, 8, 32>}, {pipeline_mode = #tpu.pipeline_mode<synchronous>, transform_indices = @transform_1, window_bounds = array<i64: 32, 96>}, {pipeline_mode = #tpu.pipeline_mode<synchronous>, transform_indices = @transform_2, window_bounds = array<i64: 1, 96>}, {pipeline_mode = #tpu.pipeline_mode<synchronous>, transform_indices = @transform_3, window_bounds = array<i64: 32, 32>}, {pipeline_mode = #tpu.pipeline_mode<synchronous>, transform_indices = @transform_4, window_bounds = array<i64: 1, 32>}, {transform_indices = @transform_5, window_bounds = array<i64: 2, 32>}]} {
    %c0 = arith.constant 0 : index
    %c0_0 = arith.constant 0 : index
    %0 = vector.load %arg2[%c0, %c0_0] : memref<32x96xf32, #tpu.memory_space<vmem>>, vector<32x96xf32>
    %1 = arith.truncf %0 : vector<32x96xf32> to vector<32x96xbf16>
    %c0_1 = arith.constant 0 : index
    %c0_2 = arith.constant 0 : index
    %2 = vector.load %arg3[%c0_1, %c0_2] : memref<1x96xf32, #tpu.memory_space<vmem>>, vector<1x96xf32>
    %c0_3 = arith.constant 0 : index
    %c0_4 = arith.constant 0 : index
    %3 = vector.load %arg4[%c0_3, %c0_4] : memref<32x32xf32, #tpu.memory_space<vmem>>, vector<32x32xf32>
    %4 = arith.truncf %3 : vector<32x32xf32> to vector<32x32xbf16>
    %c0_5 = arith.constant 0 : index
    %c0_6 = arith.constant 0 : index
    %5 = vector.load %arg5[%c0_5, %c0_6] : memref<1x32xf32, #tpu.memory_space<vmem>>, vector<1x32xf32>
    %c0_7 = arith.constant 0 : index
    %c0_8 = arith.constant 0 : index
    %c0_9 = arith.constant 0 : index
    %6 = vector.load %arg1[%c0_7, %c0_8, %c0_9] : memref<2x8x32xf32, #tpu.memory_space<vmem>>, vector<2x8x32xf32>
    %7 = vector.shape_cast %6 : vector<2x8x32xf32> to vector<16x32xf32>
    %8 = arith.truncf %7 : vector<16x32xf32> to vector<16x32xbf16>
    %cst = arith.constant dense<0.000000e+00> : vector<16x96xf32>
    %9 = tpu.matmul %8, %1, %cst {dimension_numbers = #tpu.dot_dimension_numbers<[1], [0], [0], [1], [0, 0, 1, 1], [], []>} : vector<16x32xbf16>, vector<32x96xbf16>, vector<16x96xf32> -> vector<16x96xf32>
    %10 = vector.broadcast %2 : vector<1x96xf32> to vector<16x96xf32>
    %11 = arith.addf %9, %10 : vector<16x96xf32>
    %12 = vector.shape_cast %11 : vector<16x96xf32> to vector<2x8x96xf32>
    %13 = vector.extract_strided_slice %12 {offsets = [0, 0, 0], sizes = [2, 8, 32], strides = [1, 1, 1]} : vector<2x8x96xf32> to vector<2x8x32xf32>
    %14 = arith.truncf %13 : vector<2x8x32xf32> to vector<2x8x32xbf16>
    %15 = vector.extract_strided_slice %12 {offsets = [0, 0, 32], sizes = [2, 8, 32], strides = [1, 1, 1]} : vector<2x8x96xf32> to vector<2x8x32xf32>
    %16 = arith.truncf %15 : vector<2x8x32xf32> to vector<2x8x32xbf16>
    %17 = vector.extract_strided_slice %12 {offsets = [0, 0, 64], sizes = [2, 8, 32], strides = [1, 1, 1]} : vector<2x8x96xf32> to vector<2x8x32xf32>
    %cst_10 = arith.constant 0.000000e+00 : f32
    %18 = vector.broadcast %cst_10 : f32 to vector<2x32xf32>
    %19 = vector.extract_strided_slice %14 {offsets = [0, 0, 0], sizes = [2, 8, 8], strides = [1, 1, 1]} : vector<2x8x32xbf16> to vector<2x8x8xbf16>
    %20 = vector.extract_strided_slice %16 {offsets = [0, 0, 0], sizes = [2, 8, 8], strides = [1, 1, 1]} : vector<2x8x32xbf16> to vector<2x8x8xbf16>
    %21 = vector.extract_strided_slice %17 {offsets = [0, 0, 0], sizes = [2, 8, 8], strides = [1, 1, 1]} : vector<2x8x32xf32> to vector<2x8x8xf32>
    "tpu.trace_start"() <{level = 10 : i32, message = "bqd,bkd->bqk"}> : () -> ()
    %cst_11 = arith.constant dense<0.000000e+00> : vector<2x8x8xf32>
    %22 = tpu.matmul %19, %20, %cst_11 {dimension_numbers = #tpu.dot_dimension_numbers<[2], [2], [1], [1], [0, 0, 0, 1, 1, 1], [0], [0]>} : vector<2x8x8xbf16>, vector<2x8x8xbf16>, vector<2x8x8xf32> -> vector<2x8x8xf32>
    "tpu.trace_stop"() : () -> ()
    %cst_12 = arith.constant dense<0xFF800000> : vector<2x8xf32>
    %23 = vector.multi_reduction <maximumf>, %22, %cst_12 [2] : vector<2x8x8xf32> to vector<2x8xf32>
    %24 = vector.shape_cast %23 : vector<2x8xf32> to vector<2x8x1xf32>
    %25 = vector.broadcast %24 : vector<2x8x1xf32> to vector<2x8x8xf32>
    %26 = arith.subf %22, %25 : vector<2x8x8xf32>
    %27 = math.exp %26 : vector<2x8x8xf32>
    %cst_13 = arith.constant dense<0.000000e+00> : vector<2x8xf32>
    %28 = vector.multi_reduction <add>, %27, %cst_13 [2] : vector<2x8x8xf32> to vector<2x8xf32>
    %29 = vector.shape_cast %28 : vector<2x8xf32> to vector<2x8x1xf32>
    %30 = tpu.reciprocal %29 {approx = true} : vector<2x8x1xf32> -> vector<2x8x1xf32>
    %cst_14 = arith.constant 1.250000e-01 : f32
    %31 = vector.broadcast %cst_14 : f32 to vector<2x8x1xf32>
    %32 = arith.mulf %30, %31 : vector<2x8x1xf32>
    %33 = vector.broadcast %32 : vector<2x8x1xf32> to vector<2x8x8xf32>
    %34 = arith.mulf %27, %33 : vector<2x8x8xf32>
    %cst_15 = arith.constant dense<0.000000e+00> : vector<2x8xf32>
    %35 = vector.multi_reduction <add>, %34, %cst_15 [1] : vector<2x8x8xf32> to vector<2x8xf32>
    %36 = vector.shape_cast %35 : vector<2x8xf32> to vector<2x8x1xf32>
    %37 = vector.broadcast %36 : vector<2x8x1xf32> to vector<2x8x8xf32>
    %38 = arith.mulf %37, %21 : vector<2x8x8xf32>
    %cst_16 = arith.constant dense<0.000000e+00> : vector<2x8xf32>
    %39 = vector.multi_reduction <add>, %38, %cst_16 [1] : vector<2x8x8xf32> to vector<2x8xf32>
    %40 = arith.truncf %39 : vector<2x8xf32> to vector<2x8xbf16>
    %41 = vector.extract_strided_slice %4 {offsets = [0, 0], sizes = [8, 32], strides = [1, 1]} : vector<32x32xbf16> to vector<8x32xbf16>
    %cst_17 = arith.constant dense<0.000000e+00> : vector<2x32xf32>
    %42 = tpu.matmul %40, %41, %cst_17 {dimension_numbers = #tpu.dot_dimension_numbers<[1], [0], [0], [1], [0, 0, 1, 1], [], []>} : vector<2x8xbf16>, vector<8x32xbf16>, vector<2x32xf32> -> vector<2x32xf32>
    %43 = arith.addf %18, %42 : vector<2x32xf32>
    %44 = vector.extract_strided_slice %14 {offsets = [0, 0, 8], sizes = [2, 8, 8], strides = [1, 1, 1]} : vector<2x8x32xbf16> to vector<2x8x8xbf16>
    %45 = vector.extract_strided_slice %16 {offsets = [0, 0, 8], sizes = [2, 8, 8], strides = [1, 1, 1]} : vector<2x8x32xbf16> to vector<2x8x8xbf16>
    %46 = vector.extract_strided_slice %17 {offsets = [0, 0, 8], sizes = [2, 8, 8], strides = [1, 1, 1]} : vector<2x8x32xf32> to vector<2x8x8xf32>
    "tpu.trace_start"() <{level = 10 : i32, message = "bqd,bkd->bqk"}> : () -> ()
    %cst_18 = arith.constant dense<0.000000e+00> : vector<2x8x8xf32>
    %47 = tpu.matmul %44, %45, %cst_18 {dimension_numbers = #tpu.dot_dimension_numbers<[2], [2], [1], [1], [0, 0, 0, 1, 1, 1], [0], [0]>} : vector<2x8x8xbf16>, vector<2x8x8xbf16>, vector<2x8x8xf32> -> vector<2x8x8xf32>
    "tpu.trace_stop"() : () -> ()
    %cst_19 = arith.constant dense<0xFF800000> : vector<2x8xf32>
    %48 = vector.multi_reduction <maximumf>, %47, %cst_19 [2] : vector<2x8x8xf32> to vector<2x8xf32>
    %49 = vector.shape_cast %48 : vector<2x8xf32> to vector<2x8x1xf32>
    %50 = vector.broadcast %49 : vector<2x8x1xf32> to vector<2x8x8xf32>
    %51 = arith.subf %47, %50 : vector<2x8x8xf32>
    %52 = math.exp %51 : vector<2x8x8xf32>
    %cst_20 = arith.constant dense<0.000000e+00> : vector<2x8xf32>
    %53 = vector.multi_reduction <add>, %52, %cst_20 [2] : vector<2x8x8xf32> to vector<2x8xf32>
    %54 = vector.shape_cast %53 : vector<2x8xf32> to vector<2x8x1xf32>
    %55 = tpu.reciprocal %54 {approx = true} : vector<2x8x1xf32> -> vector<2x8x1xf32>
    %cst_21 = arith.constant 1.250000e-01 : f32
    %56 = vector.broadcast %cst_21 : f32 to vector<2x8x1xf32>
    %57 = arith.mulf %55, %56 : vector<2x8x1xf32>
    %58 = vector.broadcast %57 : vector<2x8x1xf32> to vector<2x8x8xf32>
    %59 = arith.mulf %52, %58 : vector<2x8x8xf32>
    %cst_22 = arith.constant dense<0.000000e+00> : vector<2x8xf32>
    %60 = vector.multi_reduction <add>, %59, %cst_22 [1] : vector<2x8x8xf32> to vector<2x8xf32>
    %61 = vector.shape_cast %60 : vector<2x8xf32> to vector<2x8x1xf32>
    %62 = vector.broadcast %61 : vector<2x8x1xf32> to vector<2x8x8xf32>
    %63 = arith.mulf %62, %46 : vector<2x8x8xf32>
    %cst_23 = arith.constant dense<0.000000e+00> : vector<2x8xf32>
    %64 = vector.multi_reduction <add>, %63, %cst_23 [1] : vector<2x8x8xf32> to vector<2x8xf32>
    %65 = arith.truncf %64 : vector<2x8xf32> to vector<2x8xbf16>
    %66 = vector.extract_strided_slice %4 {offsets = [8, 0], sizes = [8, 32], strides = [1, 1]} : vector<32x32xbf16> to vector<8x32xbf16>
    %cst_24 = arith.constant dense<0.000000e+00> : vector<2x32xf32>
    %67 = tpu.matmul %65, %66, %cst_24 {dimension_numbers = #tpu.dot_dimension_numbers<[1], [0], [0], [1], [0, 0, 1, 1], [], []>} : vector<2x8xbf16>, vector<8x32xbf16>, vector<2x32xf32> -> vector<2x32xf32>
    %68 = arith.addf %43, %67 : vector<2x32xf32>
    %69 = vector.extract_strided_slice %14 {offsets = [0, 0, 16], sizes = [2, 8, 8], strides = [1, 1, 1]} : vector<2x8x32xbf16> to vector<2x8x8xbf16>
    %70 = vector.extract_strided_slice %16 {offsets = [0, 0, 16], sizes = [2, 8, 8], strides = [1, 1, 1]} : vector<2x8x32xbf16> to vector<2x8x8xbf16>
    %71 = vector.extract_strided_slice %17 {offsets = [0, 0, 16], sizes = [2, 8, 8], strides = [1, 1, 1]} : vector<2x8x32xf32> to vector<2x8x8xf32>
    "tpu.trace_start"() <{level = 10 : i32, message = "bqd,bkd->bqk"}> : () -> ()
    %cst_25 = arith.constant dense<0.000000e+00> : vector<2x8x8xf32>
    %72 = tpu.matmul %69, %70, %cst_25 {dimension_numbers = #tpu.dot_dimension_numbers<[2], [2], [1], [1], [0, 0, 0, 1, 1, 1], [0], [0]>} : vector<2x8x8xbf16>, vector<2x8x8xbf16>, vector<2x8x8xf32> -> vector<2x8x8xf32>
    "tpu.trace_stop"() : () -> ()
    %cst_26 = arith.constant dense<0xFF800000> : vector<2x8xf32>
    %73 = vector.multi_reduction <maximumf>, %72, %cst_26 [2] : vector<2x8x8xf32> to vector<2x8xf32>
    %74 = vector.shape_cast %73 : vector<2x8xf32> to vector<2x8x1xf32>
    %75 = vector.broadcast %74 : vector<2x8x1xf32> to vector<2x8x8xf32>
    %76 = arith.subf %72, %75 : vector<2x8x8xf32>
    %77 = math.exp %76 : vector<2x8x8xf32>
    %cst_27 = arith.constant dense<0.000000e+00> : vector<2x8xf32>
    %78 = vector.multi_reduction <add>, %77, %cst_27 [2] : vector<2x8x8xf32> to vector<2x8xf32>
    %79 = vector.shape_cast %78 : vector<2x8xf32> to vector<2x8x1xf32>
    %80 = tpu.reciprocal %79 {approx = true} : vector<2x8x1xf32> -> vector<2x8x1xf32>
    %cst_28 = arith.constant 1.250000e-01 : f32
    %81 = vector.broadcast %cst_28 : f32 to vector<2x8x1xf32>
    %82 = arith.mulf %80, %81 : vector<2x8x1xf32>
    %83 = vector.broadcast %82 : vector<2x8x1xf32> to vector<2x8x8xf32>
    %84 = arith.mulf %77, %83 : vector<2x8x8xf32>
    %cst_29 = arith.constant dense<0.000000e+00> : vector<2x8xf32>
    %85 = vector.multi_reduction <add>, %84, %cst_29 [1] : vector<2x8x8xf32> to vector<2x8xf32>
    %86 = vector.shape_cast %85 : vector<2x8xf32> to vector<2x8x1xf32>
    %87 = vector.broadcast %86 : vector<2x8x1xf32> to vector<2x8x8xf32>
    %88 = arith.mulf %87, %71 : vector<2x8x8xf32>
    %cst_30 = arith.constant dense<0.000000e+00> : vector<2x8xf32>
    %89 = vector.multi_reduction <add>, %88, %cst_30 [1] : vector<2x8x8xf32> to vector<2x8xf32>
    %90 = arith.truncf %89 : vector<2x8xf32> to vector<2x8xbf16>
    %91 = vector.extract_strided_slice %4 {offsets = [16, 0], sizes = [8, 32], strides = [1, 1]} : vector<32x32xbf16> to vector<8x32xbf16>
    %cst_31 = arith.constant dense<0.000000e+00> : vector<2x32xf32>
    %92 = tpu.matmul %90, %91, %cst_31 {dimension_numbers = #tpu.dot_dimension_numbers<[1], [0], [0], [1], [0, 0, 1, 1], [], []>} : vector<2x8xbf16>, vector<8x32xbf16>, vector<2x32xf32> -> vector<2x32xf32>
    %93 = arith.addf %68, %92 : vector<2x32xf32>
    %94 = vector.extract_strided_slice %14 {offsets = [0, 0, 24], sizes = [2, 8, 8], strides = [1, 1, 1]} : vector<2x8x32xbf16> to vector<2x8x8xbf16>
    %95 = vector.extract_strided_slice %16 {offsets = [0, 0, 24], sizes = [2, 8, 8], strides = [1, 1, 1]} : vector<2x8x32xbf16> to vector<2x8x8xbf16>
    %96 = vector.extract_strided_slice %17 {offsets = [0, 0, 24], sizes = [2, 8, 8], strides = [1, 1, 1]} : vector<2x8x32xf32> to vector<2x8x8xf32>
    "tpu.trace_start"() <{level = 10 : i32, message = "bqd,bkd->bqk"}> : () -> ()
    %cst_32 = arith.constant dense<0.000000e+00> : vector<2x8x8xf32>
    %97 = tpu.matmul %94, %95, %cst_32 {dimension_numbers = #tpu.dot_dimension_numbers<[2], [2], [1], [1], [0, 0, 0, 1, 1, 1], [0], [0]>} : vector<2x8x8xbf16>, vector<2x8x8xbf16>, vector<2x8x8xf32> -> vector<2x8x8xf32>
    "tpu.trace_stop"() : () -> ()
    %cst_33 = arith.constant dense<0xFF800000> : vector<2x8xf32>
    %98 = vector.multi_reduction <maximumf>, %97, %cst_33 [2] : vector<2x8x8xf32> to vector<2x8xf32>
    %99 = vector.shape_cast %98 : vector<2x8xf32> to vector<2x8x1xf32>
    %100 = vector.broadcast %99 : vector<2x8x1xf32> to vector<2x8x8xf32>
    %101 = arith.subf %97, %100 : vector<2x8x8xf32>
    %102 = math.exp %101 : vector<2x8x8xf32>
    %cst_34 = arith.constant dense<0.000000e+00> : vector<2x8xf32>
    %103 = vector.multi_reduction <add>, %102, %cst_34 [2] : vector<2x8x8xf32> to vector<2x8xf32>
    %104 = vector.shape_cast %103 : vector<2x8xf32> to vector<2x8x1xf32>
    %105 = tpu.reciprocal %104 {approx = true} : vector<2x8x1xf32> -> vector<2x8x1xf32>
    %cst_35 = arith.constant 1.250000e-01 : f32
    %106 = vector.broadcast %cst_35 : f32 to vector<2x8x1xf32>
    %107 = arith.mulf %105, %106 : vector<2x8x1xf32>
    %108 = vector.broadcast %107 : vector<2x8x1xf32> to vector<2x8x8xf32>
    %109 = arith.mulf %102, %108 : vector<2x8x8xf32>
    %cst_36 = arith.constant dense<0.000000e+00> : vector<2x8xf32>
    %110 = vector.multi_reduction <add>, %109, %cst_36 [1] : vector<2x8x8xf32> to vector<2x8xf32>
    %111 = vector.shape_cast %110 : vector<2x8xf32> to vector<2x8x1xf32>
    %112 = vector.broadcast %111 : vector<2x8x1xf32> to vector<2x8x8xf32>
    %113 = arith.mulf %112, %96 : vector<2x8x8xf32>
    %cst_37 = arith.constant dense<0.000000e+00> : vector<2x8xf32>
    %114 = vector.multi_reduction <add>, %113, %cst_37 [1] : vector<2x8x8xf32> to vector<2x8xf32>
    %115 = arith.truncf %114 : vector<2x8xf32> to vector<2x8xbf16>
    %116 = vector.extract_strided_slice %4 {offsets = [24, 0], sizes = [8, 32], strides = [1, 1]} : vector<32x32xbf16> to vector<8x32xbf16>
    %cst_38 = arith.constant dense<0.000000e+00> : vector<2x32xf32>
    %117 = tpu.matmul %115, %116, %cst_38 {dimension_numbers = #tpu.dot_dimension_numbers<[1], [0], [0], [1], [0, 0, 1, 1], [], []>} : vector<2x8xbf16>, vector<8x32xbf16>, vector<2x32xf32> -> vector<2x32xf32>
    %118 = arith.addf %93, %117 : vector<2x32xf32>
    %119 = vector.broadcast %5 : vector<1x32xf32> to vector<2x32xf32>
    %120 = arith.addf %118, %119 : vector<2x32xf32>
    %c0_39 = arith.constant 0 : index
    %c0_40 = arith.constant 0 : index
    %121 = vector.load %arg6[%c0_39, %c0_40] : memref<2x32xf32, #tpu.memory_space<vmem>>, vector<2x32xf32>
    tpu.vector_store %arg6[%c0_39, %c0_40], %120 {strides = array<i32>} : memref<2x32xf32, #tpu.memory_space<vmem>>, vector<2x32xf32>,
    return
  }
  func.func @transform_0(%arg0: i32) -> (i32, i32, i32) {
    %c0_i32 = arith.constant 0 : i32
    %c0_i32_0 = arith.constant 0 : i32
    %c0_i32_1 = arith.constant 0 : i32
    return %arg0, %c0_i32, %c0_i32_0 : i32, i32, i32
  }
  func.func @transform_1(%arg0: i32) -> (i32, i32) {
    %c0_i32 = arith.constant 0 : i32
    %c0_i32_0 = arith.constant 0 : i32
    %c0_i32_1 = arith.constant 0 : i32
    return %c0_i32, %c0_i32_0 : i32, i32
  }
  func.func @transform_2(%arg0: i32) -> (i32, i32) {
    %c0_i32 = arith.constant 0 : i32
    %c0_i32_0 = arith.constant 0 : i32
    %c0_i32_1 = arith.constant 0 : i32
    return %c0_i32, %c0_i32_0 : i32, i32
  }
  func.func @transform_3(%arg0: i32) -> (i32, i32) {
    %c0_i32 = arith.constant 0 : i32
    %c0_i32_0 = arith.constant 0 : i32
    %c0_i32_1 = arith.constant 0 : i32
    return %c0_i32, %c0_i32_0 : i32, i32
  }
  func.func @transform_4(%arg0: i32) -> (i32, i32) {
    %c0_i32 = arith.constant 0 : i32
    %c0_i32_0 = arith.constant 0 : i32
    %c0_i32_1 = arith.constant 0 : i32
    return %c0_i32, %c0_i32_0 : i32, i32
  }
  func.func @transform_5(%arg0: i32) -> (i32, i32) {
    %c0_i32 = arith.constant 0 : i32
    %c0_i32_0 = arith.constant 0 : i32
    return %arg0, %c0_i32 : i32, i32
  }
}

</mosaic_0001>

<bundles_post_ra>
// kernel: tpu_custom_call.1
= control target key start
LH: loop header
LB: loop body
LE: loop exit
PB: predicated region body
PF: predicated region fallthrough
CT: control target
= control target key end

     0   :  { %10 = vsyncpa [#allocation3], 0  ;;  %s1501_s0 = inlined_call_operand.hbm [shape: f32[2,8,32], index: 0, kind: input, shape index: {}]   ;;  %s1502_s1 = inlined_call_operand.hbm [shape: f32[32,96], index: 1, kind: input, shape index: {}]   ;;  %s1503_s2 = inlined_call_operand.vmem [shape: f32[1,96], index: 2, kind: input, shape index: {}]   ;;  %s1504_s3 = inlined_call_operand.hbm [shape: f32[32,32], index: 3, kind: input, shape index: {}]   ;;  %s1505_s4 = inlined_call_operand.vmem [shape: f32[1,32], index: 4, kind: input, shape index: {}]   ;;  %s1506_s5 = inlined_call_operand.hbm [shape: f32[2,32], index: 5, kind: output, shape index: {}]  }
   0x1   :  { %11 = vsyncpa [#allocation6], 0 }
   0x2   :  { %12 = vsyncpa [#allocation4], 0  ;;  %s1292_s18 = smov [#allocation5]   ;;  %s1293_s20 = smov [#allocation2]  }
   0x3   :  { %s30_s19 = sshll.u32 %s1292_s18, 4  ;;  %s18_s21 = sshll.u32 %s1293_s20, 4  ;;  %s31_s19 = int_to_ptr.vmem [resolvable:$true] %s30_s19  ;;  %s19_s21 = int_to_ptr.vmem [resolvable:$true] %s18_s21 }
   0x4   :  { %s1214_s22 = scalar_lea.vmem %s31_s19, 512  ;;  %p1219_p1 = scmp.lt.s32.totalorder %s31_s19, %s31_s19 }
   0x5   :  { %p1215_p0 = scmp.ne.s32.totalorder %s31_s19, %s1214_s22  ;;  %p1220_p2 = scmp.lt.s32.totalorder %s1214_s22, %s1214_s22 }
   0x7   :  { %p1221_p3 = por %p1220_p2, %p1219_p1 }
   0x9   :  { %p1222_p4 = pnand %p1221_p3, %p1215_p0 }
   0xb   :  { %1225 = shalt.err (!%p1222_p4)
}
   0xc   :  { %s1294_s23 = smov 128   ;;  %s1295_s24 = smov 8  }
   0xd   :  { %36 = dma.hbm_to_vmem [thread:$0]  %s1502_s1, 512, %s31_s19, [#allocation6], %s1294_s23, %s1294_s23, %s1295_s24  }
   0xe   :  { %s1234_s27 = scalar_lea.vmem %s19_s21, 256  ;;  %p1239_p6 = scmp.lt.s32.totalorder %s19_s21, %s19_s21 }
   0xf   :  { %p1235_p5 = scmp.ne.s32.totalorder %s19_s21, %s1234_s27  ;;  %p1240_p7 = scmp.lt.s32.totalorder %s1234_s27, %s1234_s27 }
  0x11   :  { %p1241_p8 = por %p1240_p7, %p1239_p6 }
  0x13   :  { %p1242_p9 = pnand %p1241_p8, %p1235_p5 }
  0x15   :  { %1245 = shalt.err (!%p1242_p9)
}
  0x16   :  { %24 = dma.hbm_to_vmem [thread:$0]  %s1501_s0, 256, %s19_s21, [#allocation3], %s1294_s23, %s1294_s23, %s1295_s24  }
  0x17   :  { %s1296_s30 = smov [#allocation7]  }
  0x18   :  { %s44_s6 = sshll.u32 %s1296_s30, 4  ;;  %s45_s6 = int_to_ptr.vmem [resolvable:$true] %s44_s6 }
  0x19   :  { %s1254_s7 = scalar_lea.vmem %s45_s6, 512  ;;  %p1259_p11 = scmp.lt.s32.totalorder %s45_s6, %s45_s6 }
  0x1a   :  { %p1255_p10 = scmp.ne.s32.totalorder %s45_s6, %s1254_s7  ;;  %p1260_p12 = scmp.lt.s32.totalorder %s1254_s7, %s1254_s7 }
  0x1c   :  { %p1261_p13 = por %p1260_p12, %p1259_p11 }
  0x1e   :  { %p1262_p0 = pnand %p1261_p13, %p1255_p10 }
  0x20   :  { %1265 = shalt.err (!%p1262_p0)
}
  0x21   :  { %50 = dma.hbm_to_vmem [thread:$0]  %s1504_s3, 512, %s45_s6, [#allocation6], %s1294_s23, %s1294_s23, %s1295_s24  }
  0x22   :  { %1286 = dma.done.wait [#allocation3], 256  }
  0x23   :  { %1287 = vsyncadd [#allocation3], 4294967040 }
  0x24   :  { %1288 = dma.done.wait [#allocation6], 1024  }
  0x25   :  { %1289 = vsyncadd [#allocation6], 4294966272  ;;  %v1297_v0 = vmov 0.0   ;;  %vm1298_vm0 = vmmov 0   ;;  %v65_v1 = vld [vmem:[#allocation5 + $0x10] sm:$0xff]  ;;  %v66_v2 = vld [vmem:[#allocation5 + $0x18] sm:$0xff] }
  0x26   :  { %1075 = vmatprep.subr.bf16.mxu0 %v1297_v0  ;;  %1079 = vmatprep.mubr.msk.bf16.mxu0 %vm1298_vm0, %v1297_v0  ;;  %v63_v3 = vld [vmem:[#allocation5] sm:$0xff]  ;;  %v68_v4 = vpack.c.bf16 %v66_v2, %v65_v1  ;;  %v64_v5 = vld [vmem:[#allocation5 + $0x8] sm:$0xff]  ;;  %v77_v7 = vld [vmem:[#allocation2] sm:$0xff]  ;;  %vm86_vm1 = vcmask 261120   ;;  %s1299_s9 = smov 88   ;;  %s1300_s10 = smov 96  }
  0x27   :  { %1083 = vmatprep.subr.bf16.mxu1 %v1297_v0  ;;  %1085 = vmatprep.mubr.msk.bf16.mxu1 %vm1298_vm0, %v1297_v0  ;;  %v67_v6 = vpack.c.bf16 %v64_v5, %v63_v3  ;;  %v78_v8 = vld [vmem:[#allocation2 + $0x8] sm:$0xff]  ;;  %v1033_v10 = vld [vmem:[%s1503_s2] ss:$0 sm:$0xff]  ;;  %s1301_s2 = smov 120   ;;  %vm136_vm2 = vcmask 64512   ;;  %vm472_vm3 = vcmask 1043456  }
  0x28   :  { %1076 = vmatpush3.bf16.msra.mxu0 %v68_v4  ;;  %v79_v9 = vpack.c.bf16 %v78_v8, %v77_v7  ;;  %vm278_vm4 = vcmask 589312   ;;  %vm441_vm5 = vcmask 654912   ;;  %vm462_vm6 = vcmask 1041409   ;;  %s1302_s11 = smov 64   ;;  %s1303_s12 = smov 80  }
  0x29   :  { %1077 = vmatprep.subr.bf16.mxu0 %v1297_v0  ;;  %s1304_s13 = smov 56   ;;  %s1305_s14 = smov 112   ;;  %vm716_vm7 = vcmask 720512   ;;  %vm934_vm8 = vcmask 786112   ;;  %vm1015_vm9 = vcmask 254976  }
  0x2a   :  { %s1306_s15 = smov 72   ;;  %s1307_s16 = smov 104  }
  0x2b   :  { %s1308_s17 = smov 48   ;;  %s1309_s18 = smov 40  }
  0x2c   :  { %1078 = vmatpush3.bf16.msra.mxu0 %v67_v6  ;;  %s1310_s21 = smov [#allocation8]  }
  0x2d   :  { %1089 = vmatprep.subr.bf16.mxu0 %v1297_v0  ;;  %s1023_s22 = sshll.u32 %s1310_s21, 4  ;;  %s1024_s22 = int_to_ptr.vmem [resolvable:$true] %s1023_s22 }
  0x2e   :  { %s1266_s23 = scalar_lea.vmem %s1024_s22, 32  ;;  %p1271_p2 = scmp.lt.s32.totalorder %s1024_s22, %s1024_s22 }
  0x2f   :  { %1080 = vmatmul.mubr.msk.bf16.vlgmr.msra.gmra.mxu0 %vm86_vm1, %v79_v9  ;;  %p1267_p1 = scmp.ne.s32.totalorder %s1024_s22, %s1266_s23  ;;  %p1272_p3 = scmp.lt.s32.totalorder %s1266_s23, %s1266_s23 }
  0x30   :  { %1091 = vmatprep.mubr.msk.bf16.mxu0 %vm1298_vm0, %v1297_v0 }
  0x31   :  { %p1273_p4 = por %p1272_p3, %p1271_p2 }
  0x33   :  { %p1274_p5 = pnand %p1273_p4, %p1267_p1 }
  0xef   :  { %v124_v11 = vpop.f32.mrf.mxu0 }
  0xf0   :  { %v1363_v12 = vadd.f32 %v1033_v10, %v124_v11 }
  0xf1   :  { %v1081_v13 = vpop.f32.mrf.mxu0 }
  0xf2   :  { %v1367_v14 = vpack.c.bf16 %v1363_v12, %v1363_v12 }
  0xf3   :  { %v127_v15 = vpop.f32.mrf.mxu0 }
  0xf4   :  { %v1369_v16 = vadd.f32 %v1033_v10, %v127_v15  ;;  %297 = vrot.lane.b32.xlu1 %v1367_v14, %s1299_s9  ;;  %134 = vrot.lane.b32.xlu0 %v1367_v14, %s1300_s10 }
  0xf5   :  { %v1082_v17 = vpop.f32.mrf.mxu0 }
  0xf6   :  { %v1375_v18 = vpack.c.bf16 %v1369_v16, %v1369_v16 }
  0xf8   :  { %347 = vrot.lane.b32.xlu1 %v1375_v18, %s1299_s9  ;;  %184 = vrot.lane.b32.xlu0 %v1375_v18, %s1300_s10 }
  0xfc   :  { %345 = vrot.lane.b32.xlu1 %v1375_v18, %s1301_s2  ;;  %295 = vrot.lane.b32.xlu0 %v1367_v14, %s1301_s2 }
 0x166   :  { %v135_v19 = vpop.permute.xlu0 %134  ;;  %v298_v21 = vpop.permute.xlu1 %297 }
 0x167   :  { %v141_v20 = vsel %vm136_vm2, %v135_v19, 0  ;;  %v303_v24 = vsel %vm136_vm2, %v298_v21, 0 }
 0x168   :  { %1084 = vmatpush3.bf16.xpose.msra.mxu1 %v141_v20 }
 0x169   :  { %1095 = vmatprep.subr.bf16.mxu1 %v1297_v0 }
 0x16a   :  { %v185_v22 = vpop.permute.xlu0 %184  ;;  %v348_v25 = vpop.permute.xlu1 %347 }
 0x16b   :  { %v190_v23 = vsel %vm136_vm2, %v185_v22, 0  ;;  %v353_v26 = vsel %vm136_vm2, %v348_v25, 0 }
 0x16c   :  { %1090 = vmatpush3.bf16.xpose.msra.mxu0 %v190_v23 }
 0x16d   :  { %1101 = vmatprep.subr.bf16.mxu0 %v1297_v0 }
 0x16e   :  { %v296_v27 = vpop.permute.xlu0 %295  ;;  %v346_v28 = vpop.permute.xlu1 %345 }
 0x16f   :  { %1086 = vmatmul.mubr.msk.bf16.vlgmr.msra.gmra.mxu1 %vm136_vm2, %v1367_v14 }
 0x170   :  { %1096 = vmatpush3.bf16.xpose.msra.mxu1 %v303_v24  ;;  %1097 = vmatprep.mubr.msk.bf16.mxu1 %vm1298_vm0, %v1297_v0 }
 0x171   :  { %1107 = vmatprep.subr.bf16.mxu1 %v1297_v0 }
 0x173   :  { %1092 = vmatmul.mubr.msk.bf16.vlgmr.msra.gmra.mxu0 %vm136_vm2, %v1375_v18 }
 0x174   :  { %1102 = vmatpush3.bf16.xpose.msra.mxu0 %v353_v26  ;;  %1103 = vmatprep.mubr.msk.bf16.mxu0 %vm1298_vm0, %v1297_v0 }
 0x175   :  { %1113 = vmatprep.subr.bf16.mxu0 %v1297_v0 }
 0x177   :  { %1098 = vmatmul.mubr.msk.bf16.vlgmr.msra.gmra.mxu1 %vm136_vm2, %v296_v27 }
 0x178   :  { %1109 = vmatprep.mubr.msk.bf16.mxu1 %vm1298_vm0, %v1297_v0 }
 0x17b   :  { %1104 = vmatmul.mubr.msk.bf16.vlgmr.msra.gmra.mxu0 %vm136_vm2, %v346_v28 }
 0x17c   :  { %1115 = vmatprep.mubr.msk.bf16.mxu0 %vm1298_vm0, %v1297_v0 }
 0x22f   :  { %v177_v29 = vpop.f32.mrf.mxu1 }
 0x230   :  { %v232_v30 = vsel %vm136_vm2, %v177_v29, -inf }
 0x231   :  { %v1087_v31 = vpop.f32.mrf.mxu1  ;;  %233 = vmax.xlane.f32.xlu0 %v232_v30 }
 0x233   :  { %v180_v32 = vpop.f32.mrf.mxu1  ;;  %v226_v33 = vpop.f32.mrf.mxu0 }
 0x234   :  { %v235_v34 = vsel %vm136_vm2, %v226_v33, -inf }
 0x235   :  { %v1088_v35 = vpop.f32.mrf.mxu1  ;;  %236 = vmax.xlane.f32.xlu1 %v235_v34  ;;  %v1093_v36 = vpop.f32.mrf.mxu0 }
 0x237   :  { %v229_v37 = vpop.f32.mrf.mxu0  ;;  %v339_v38 = vpop.f32.mrf.mxu1 }
 0x238   :  { %v395_v39 = vsel %vm136_vm2, %v339_v38, -inf }
 0x239   :  { %396 = vmax.xlane.f32.xlu0 %v395_v39  ;;  %v1094_v40 = vpop.f32.mrf.mxu0  ;;  %v1099_v41 = vpop.f32.mrf.mxu1 }
 0x23b   :  { %v342_v42 = vpop.f32.mrf.mxu1  ;;  %v389_v43 = vpop.f32.mrf.mxu0 }
 0x23c   :  { %v398_v44 = vsel %vm136_vm2, %v389_v43, -inf }
 0x23d   :  { %v1100_v45 = vpop.f32.mrf.mxu1  ;;  %399 = vmax.xlane.f32.xlu0 %v398_v44  ;;  %v1105_v46 = vpop.f32.mrf.mxu0 }
 0x23f   :  { %v392_v47 = vpop.f32.mrf.mxu0 }
 0x241   :  { %v1106_v48 = vpop.f32.mrf.mxu0 }
 0x2ba   :  { %v234_v49 = vpop.xlane.xlu0 %233 }
 0x2bb   :  { %v238_v50 = vsub.f32 %v177_v29, %v234_v49 }
 0x2bd   :  { %v240_v51 = vmul.f32 1.442695, %v238_v50 }
 0x2be   :  { %v237_v52 = vpop.xlane.xlu1 %236 }
 0x2bf   :  { %1174 = vpow2.f32 %v240_v51  ;;  %v239_v53 = vsub.f32 %v226_v33, %v237_v52 }
 0x2c1   :  { %v242_v54 = vmul.f32 1.442695, %v239_v53 }
 0x2c2   :  { %v397_v55 = vpop.xlane.xlu0 %396 }
 0x2c3   :  { %1176 = vpow2.f32 %v242_v54  ;;  %v401_v56 = vsub.f32 %v339_v38, %v397_v55  ;;  %v70_v54 = vld [vmem:[#allocation7] sm:$0xff]  ;;  %v71_v55 = vld [vmem:[#allocation7 + $0x8] sm:$0xff] }
 0x2c5   :  { %v403_v57 = vmul.f32 1.442695, %v401_v56  ;;  %v74_v56 = vpack.c.bf16 %v71_v55, %v70_v54 }
 0x2c6   :  { %v400_v58 = vpop.xlane.xlu0 %399 }
 0x2c7   :  { %1178 = vpow2.f32 %v403_v57  ;;  %v402_v59 = vsub.f32 %v389_v43, %v400_v58  ;;  %v528_v57 = vsel %vm472_vm3, %v74_v56, 0 }
 0x2c8   :  { %1114 = vmatpush3.bf16.msra.mxu0 %v528_v57 }
 0x2c9   :  { %v405_v60 = vmul.f32 1.442695, %v402_v59  ;;  %1125 = vmatprep.subr.bf16.mxu0 %v1297_v0 }
 0x2cb   :  { %1180 = vpow2.f32 %v405_v60 }
 0x2cc   :  { %v1175_v61 = vpop.eup %1174 }
 0x2cd   :  { %v244_v62 = vsel %vm136_vm2, %v1175_v61, 0.0 }
 0x2ce   :  { %245 = vadd.xlane.f32.xlu1 %v244_v62 }
 0x2d0   :  { %v1177_v63 = vpop.eup %1176 }
 0x2d1   :  { %v247_v1 = vsel %vm136_vm2, %v1177_v63, 0.0 }
 0x2d2   :  { %248 = vadd.xlane.f32.xlu0 %v247_v1 }
 0x2d4   :  { %v1179_v2 = vpop.eup %1178 }
 0x2d5   :  { %v407_v3 = vsel %vm136_vm2, %v1179_v2, 0.0 }
 0x2d6   :  { %408 = vadd.xlane.f32.xlu1 %v407_v3 }
 0x2d8   :  { %v1181_v4 = vpop.eup %1180 }
 0x2d9   :  { %v410_v5 = vsel %vm136_vm2, %v1181_v4, 0.0 }
 0x2da   :  { %411 = vadd.xlane.f32.xlu0 %v410_v5 }
 0x357   :  { %v246_v6 = vpop.xlane.xlu1 %245 }
 0x358   :  { %1182 = vrcp.f32 %v246_v6 }
 0x35b   :  { %v249_v7 = vpop.xlane.xlu0 %248 }
 0x35c   :  { %1184 = vrcp.f32 %v249_v7 }
 0x35f   :  { %v409_v8 = vpop.xlane.xlu1 %408 }
 0x360   :  { %1186 = vrcp.f32 %v409_v8 }
 0x363   :  { %v412_v9 = vpop.xlane.xlu0 %411 }
 0x364   :  { %1188 = vrcp.f32 %v412_v9 }
 0x365   :  { %v1183_v10 = vpop.eup %1182 }
 0x366   :  { %v252_v11 = vmul.f32 0.125, %v1183_v10 }
 0x368   :  { %v254_v13 = vmul.f32 %v1175_v61, %v252_v11 }
 0x369   :  { %v1185_v15 = vpop.eup %1184 }
 0x36a   :  { %v253_v17 = vmul.f32 0.125, %v1185_v15  ;;  %v256_v19 = vsel %vm136_vm2, %v254_v13, 0.0 }
 0x36b   :  { %v257_v20 = vrot.slane %v256_v19, 4 }
 0x36c   :  { %v255_v21 = vmul.f32 %v1177_v63, %v253_v17 }
 0x36d   :  { %v1187_v22 = vpop.eup %1186  ;;  %v258_v23 = vadd.f32 %v257_v20, %v256_v19 }
 0x36e   :  { %v415_v24 = vmul.f32 0.125, %v1187_v22  ;;  %v263_v25 = vsel %vm136_vm2, %v255_v21, 0.0 }
 0x36f   :  { %v259_v26 = vrot.slane %v258_v23, 2  ;;  %v264_v27 = vrot.slane %v263_v25, 4 }
 0x370   :  { %v417_v28 = vmul.f32 %v1179_v2, %v415_v24 }
 0x371   :  { %v1189_v29 = vpop.eup %1188  ;;  %v260_v30 = vadd.f32 %v259_v26, %v258_v23  ;;  %v265_v31 = vadd.f32 %v264_v27, %v263_v25  ;;  %v468_v26 = vrot.slane %v74_v56, 4 }
 0x372   :  { %v416_v32 = vmul.f32 0.125, %v1189_v29  ;;  %v419_v33 = vsel %vm136_vm2, %v417_v28, 0.0 }
 0x373   :  { %v261_v34 = vrot.slane %v260_v30, 1  ;;  %v266_v35 = vrot.slane %v265_v31, 2  ;;  %v420_v36 = vrot.slane %v419_v33, 4 }
 0x374   :  { %v418_v37 = vmul.f32 %v1181_v4, %v416_v32 }
 0x375   :  { %v262_v38 = vadd.f32 %v261_v34, %v260_v30  ;;  %v267_v39 = vadd.f32 %v266_v35, %v265_v31  ;;  %v421_v40 = vadd.f32 %v420_v36, %v419_v33  ;;  %v474_v31 = vsel %vm472_vm3, %v468_v26, 0 }
 0x376   :  { %v426_v41 = vsel %vm136_vm2, %v418_v37, 0.0  ;;  %1108 = vmatpush3.bf16.msra.mxu1 %v474_v31 }
 0x377   :  { %271 = vbcast.lane.b32.xlu1 %v262_v38, 256  ;;  %v268_v42 = vrot.slane %v267_v39, 1  ;;  %v422_v43 = vrot.slane %v421_v40, 2  ;;  %v427_v44 = vrot.slane %v426_v41, 4  ;;  %1119 = vmatprep.subr.bf16.mxu1 %v1297_v0 }
 0x379   :  { %v269_v45 = vadd.f32 %v268_v42, %v267_v39  ;;  %v423_v46 = vadd.f32 %v422_v43, %v421_v40  ;;  %v428_v47 = vadd.f32 %v427_v44, %v426_v41 }
 0x37b   :  { %274 = vbcast.lane.b32.xlu0 %v269_v45, 256  ;;  %v424_v48 = vrot.slane %v423_v46, 1  ;;  %v429_v49 = vrot.slane %v428_v47, 2 }
 0x37d   :  { %v425_v50 = vadd.f32 %v424_v48, %v423_v46  ;;  %v430_v51 = vadd.f32 %v429_v49, %v428_v47 }
 0x37f   :  { %434 = vbcast.lane.b32.xlu1 %v425_v50, 256  ;;  %v431_v52 = vrot.slane %v430_v51, 1 }
 0x381   :  { %v432_v53 = vadd.f32 %v431_v52, %v430_v51 }
 0x383   :  { %437 = vbcast.lane.b32.xlu1 %v432_v53, 256 }
 0x3e9   :  { %v272_v58 = vpop.permute.xlu1 %271 }
 0x3ea   :  { %v276_v59 = vmul.f32 %v272_v58, %v1363_v12 }
 0x3ec   :  { %v279_v60 = vsel %vm278_vm4, %v276_v59, 0.0 }
 0x3ed   :  { %v280_v61 = vrot.slane %v279_v60, 4  ;;  %v275_v62 = vpop.permute.xlu0 %274 }
 0x3ee   :  { %v277_v63 = vmul.f32 %v275_v62, %v1369_v16 }
 0x3ef   :  { %v281_v1 = vadd.f32 %v280_v61, %v279_v60 }
 0x3f0   :  { %v286_v2 = vsel %vm278_vm4, %v277_v63, 0.0 }
 0x3f1   :  { %v282_v3 = vrot.slane %v281_v1, 2  ;;  %v287_v4 = vrot.slane %v286_v2, 4  ;;  %v435_v5 = vpop.permute.xlu1 %434 }
 0x3f2   :  { %v439_v6 = vmul.f32 %v435_v5, %v1363_v12 }
 0x3f3   :  { %v283_v7 = vadd.f32 %v282_v3, %v281_v1  ;;  %v288_v8 = vadd.f32 %v287_v4, %v286_v2 }
 0x3f4   :  { %v442_v9 = vsel %vm441_vm5, %v439_v6, 0.0 }
 0x3f5   :  { %v284_v10 = vrot.slane %v283_v7, 1  ;;  %v289_v11 = vrot.slane %v288_v8, 2  ;;  %v443_v13 = vrot.slane %v442_v9, 4  ;;  %v438_v15 = vpop.permute.xlu1 %437 }
 0x3f6   :  { %v440_v17 = vmul.f32 %v438_v15, %v1369_v16 }
 0x3f7   :  { %v285_v19 = vadd.f32 %v284_v10, %v283_v7  ;;  %v290_v20 = vadd.f32 %v289_v11, %v288_v8  ;;  %v444_v21 = vadd.f32 %v443_v13, %v442_v9 }
 0x3f8   :  { %v449_v22 = vsel %vm441_vm5, %v440_v17, 0.0 }
 0x3f9   :  { %v291_v23 = vrot.slane %v290_v20, 1  ;;  %v445_v24 = vrot.slane %v444_v21, 2  ;;  %v450_v25 = vrot.slane %v449_v22, 4  ;;  %v293_v27 = vpack.c.bf16 %v285_v19, %v285_v19 }
 0x3fb   :  { %v292_v28 = vadd.f32 %v291_v23, %v290_v20  ;;  %v446_v29 = vadd.f32 %v445_v24, %v444_v21  ;;  %v451_v30 = vadd.f32 %v450_v25, %v449_v22  ;;  %v518_v35 = vunpack.c.l.b16 %v293_v27 }
 0x3fd   :  { %v294_v32 = vpack.c.bf16 %v292_v28, %v292_v28  ;;  %v447_v33 = vrot.slane %v446_v29, 1  ;;  %v452_v34 = vrot.slane %v451_v30, 2 }
 0x3ff   :  { %v519_v36 = vunpack.c.l.b16 %v294_v32  ;;  %v448_v37 = vadd.f32 %v447_v33, %v446_v29  ;;  %v453_v38 = vadd.f32 %v452_v34, %v451_v30 }
 0x401   :  { %v454_v39 = vrot.slane %v453_v38, 1  ;;  %v520_v40 = vsel %vm462_vm6, %v519_v36, %v518_v35  ;;  %v456_v42 = vpack.c.bf16 %v448_v37, %v448_v37 }
 0x402   :  { %v521_v41 = vpack.c.b16 %v520_v40, %v520_v40 }
 0x403   :  { %v455_v43 = vadd.f32 %v454_v39, %v453_v38  ;;  %v460_v45 = vunpack.c.l.b16 %v456_v42 }
 0x404   :  { %522 = vrot.lane.b32.xlu1 %v521_v41, %s1302_s11 }
 0x405   :  { %v457_v44 = vpack.c.bf16 %v455_v43, %v455_v43 }
 0x407   :  { %v461_v46 = vunpack.c.l.b16 %v457_v44 }
 0x408   :  { %622 = vrot.lane.b32.xlu1 %v1375_v18, %s1303_s12 }
 0x409   :  { %v463_v47 = vsel %vm462_vm6, %v461_v46, %v460_v45 }
 0x40a   :  { %v464_v48 = vpack.c.b16 %v463_v47, %v463_v47 }
 0x40c   :  { %465 = vrot.lane.b32.xlu0 %v464_v48, %s1304_s13  ;;  %620 = vrot.lane.b32.xlu1 %v1375_v18, %s1305_s14 }
 0x410   :  { %572 = vrot.lane.b32.xlu0 %v1367_v14, %s1303_s12 }
 0x414   :  { %570 = vrot.lane.b32.xlu0 %v1367_v14, %s1305_s14 }
 0x476   :  { %v523_v49 = vpop.permute.xlu1 %522 }
 0x477   :  { %1116 = vmatmul.mubr.msk.bf16.vlgmr.msra.gmra.mxu0 %vm136_vm2, %v523_v49  ;;  %v72_v49 = vld [vmem:[#allocation7 + $0x10] sm:$0xff] }
 0x478   :  { %1127 = vmatprep.mubr.msk.bf16.mxu0 %vm1298_vm0, %v1297_v0 }
 0x47a   :  { %v623_v50 = vpop.permute.xlu1 %622 }
 0x47b   :  { %v628_v51 = vsel %vm136_vm2, %v623_v50, 0  ;;  %v73_v50 = vld [vmem:[#allocation7 + $0x18] sm:$0xff] }
 0x47c   :  { %1126 = vmatpush3.bf16.xpose.msra.mxu0 %v628_v51  ;;  %v1457_v51 = vpack.c.bf16 %v73_v50, %v72_v49 }
 0x47d   :  { %1137 = vmatprep.subr.bf16.mxu0 %v1297_v0 }
 0x47e   :  { %v466_v52 = vpop.permute.xlu0 %465  ;;  %v621_v53 = vpop.permute.xlu1 %620 }
 0x47f   :  { %1110 = vmatmul.mubr.msk.bf16.vlgmr.msra.gmra.mxu1 %vm136_vm2, %v466_v52  ;;  %v745_v52 = vsel %vm472_vm3, %v1457_v51, 0 }
 0x480   :  { %1121 = vmatprep.mubr.msk.bf16.mxu1 %vm1298_vm0, %v1297_v0 }
 0x482   :  { %v573_v54 = vpop.permute.xlu0 %572 }
 0x483   :  { %v578_v55 = vsel %vm136_vm2, %v573_v54, 0  ;;  %1128 = vmatmul.mubr.msk.bf16.vlgmr.msra.gmra.mxu0 %vm136_vm2, %v621_v53 }
 0x484   :  { %1120 = vmatpush3.bf16.xpose.msra.mxu1 %v578_v55  ;;  %1139 = vmatprep.mubr.msk.bf16.mxu0 %vm1298_vm0, %v1297_v0 }
 0x485   :  { %1131 = vmatprep.subr.bf16.mxu1 %v1297_v0 }
 0x486   :  { %v571_v56 = vpop.permute.xlu0 %570 }
 0x48b   :  { %1122 = vmatmul.mubr.msk.bf16.vlgmr.msra.gmra.mxu1 %vm136_vm2, %v571_v56 }
 0x48c   :  { %1133 = vmatprep.mubr.msk.bf16.mxu1 %vm1298_vm0, %v1297_v0  ;;  %1132 = vmatpush3.bf16.msra.mxu1 %v745_v52 }
 0x48d   :  { %1143 = vmatprep.subr.bf16.mxu1 %v1297_v0 }
 0x537   :  { %v564_v57 = vpop.f32.mrf.mxu0 }
 0x539   :  { %v1117_v58 = vpop.f32.mrf.mxu0 }
 0x53b   :  { %v567_v59 = vpop.f32.mrf.mxu0 }
 0x53d   :  { %v1118_v60 = vpop.f32.mrf.mxu0 }
 0x53f   :  { %v510_v61 = vpop.f32.mrf.mxu1 }
 0x540   :  { %v1445_v62 = vadd.f32 %v564_v57, %v510_v61 }
 0x541   :  { %v1111_v63 = vpop.f32.mrf.mxu1 }
 0x543   :  { %v513_v1 = vpop.f32.mrf.mxu1  ;;  %v664_v2 = vpop.f32.mrf.mxu0 }
 0x544   :  { %v673_v3 = vsel %vm136_vm2, %v664_v2, -inf }
 0x545   :  { %v1112_v4 = vpop.f32.mrf.mxu1  ;;  %674 = vmax.xlane.f32.xlu1 %v673_v3  ;;  %v1129_v5 = vpop.f32.mrf.mxu0 }
 0x547   :  { %v667_v6 = vpop.f32.mrf.mxu0 }
 0x549   :  { %v1130_v7 = vpop.f32.mrf.mxu0 }
 0x54b   :  { %v614_v8 = vpop.f32.mrf.mxu1 }
 0x54c   :  { %v670_v9 = vsel %vm136_vm2, %v614_v8, -inf }
 0x54d   :  { %671 = vmax.xlane.f32.xlu0 %v670_v9  ;;  %v1123_v10 = vpop.f32.mrf.mxu1 }
 0x54f   :  { %v617_v11 = vpop.f32.mrf.mxu1 }
 0x551   :  { %v1124_v13 = vpop.f32.mrf.mxu1 }
 0x5ce   :  { %v675_v15 = vpop.xlane.xlu1 %674 }
 0x5cf   :  { %v677_v17 = vsub.f32 %v664_v2, %v675_v15 }
 0x5d1   :  { %v680_v21 = vmul.f32 1.442695, %v677_v17 }
 0x5d6   :  { %v672_v19 = vpop.xlane.xlu0 %671 }
 0x5d7   :  { %v676_v20 = vsub.f32 %v614_v8, %v672_v19 }
 0x5d9   :  { %v678_v22 = vmul.f32 1.442695, %v676_v20 }
 0x5db   :  { %1190 = vpow2.f32 %v678_v22 }
 0x5dc   :  { %1192 = vpow2.f32 %v680_v21 }
 0x5e8   :  { %v1191_v23 = vpop.eup %1190 }
 0x5e9   :  { %v682_v24 = vsel %vm136_vm2, %v1191_v23, 0.0  ;;  %v1193_v25 = vpop.eup %1192 }
 0x5ea   :  { %683 = vadd.xlane.f32.xlu0 %v682_v24  ;;  %v685_v26 = vsel %vm136_vm2, %v1193_v25, 0.0 }
 0x5ee   :  { %686 = vadd.xlane.f32.xlu0 %v685_v26 }
 0x673   :  { %v684_v27 = vpop.xlane.xlu0 %683 }
 0x674   :  { %1194 = vrcp.f32 %v684_v27 }
 0x677   :  { %v687_v28 = vpop.xlane.xlu0 %686 }
 0x678   :  { %1196 = vrcp.f32 %v687_v28 }
 0x681   :  { %v1195_v29 = vpop.eup %1194 }
 0x682   :  { %v690_v30 = vmul.f32 0.125, %v1195_v29 }
 0x684   :  { %v692_v31 = vmul.f32 %v1191_v23, %v690_v30 }
 0x685   :  { %v1197_v32 = vpop.eup %1196 }
 0x686   :  { %v691_v33 = vmul.f32 0.125, %v1197_v32  ;;  %v694_v34 = vsel %vm136_vm2, %v692_v31, 0.0 }
 0x687   :  { %v695_v35 = vrot.slane %v694_v34, 4 }
 0x688   :  { %v693_v36 = vmul.f32 %v1193_v25, %v691_v33 }
 0x689   :  { %v696_v37 = vadd.f32 %v695_v35, %v694_v34 }
 0x68a   :  { %v701_v38 = vsel %vm136_vm2, %v693_v36, 0.0 }
 0x68b   :  { %v697_v39 = vrot.slane %v696_v37, 2  ;;  %v702_v40 = vrot.slane %v701_v38, 4 }
 0x68d   :  { %v698_v41 = vadd.f32 %v697_v39, %v696_v37  ;;  %v703_v42 = vadd.f32 %v702_v40, %v701_v38 }
 0x68f   :  { %v699_v43 = vrot.slane %v698_v41, 1  ;;  %v704_v44 = vrot.slane %v703_v42, 2 }
 0x691   :  { %v700_v45 = vadd.f32 %v699_v43, %v698_v41  ;;  %v705_v46 = vadd.f32 %v704_v44, %v703_v42 }
 0x693   :  { %709 = vbcast.lane.b32.xlu1 %v700_v45, 256  ;;  %v706_v47 = vrot.slane %v705_v46, 1 }
 0x695   :  { %v707_v48 = vadd.f32 %v706_v47, %v705_v46 }
 0x697   :  { %712 = vbcast.lane.b32.xlu0 %v707_v48, 256 }
 0x69b   :  { %840 = vrot.lane.b32.xlu0 %v1375_v18, %s1306_s15 }
 0x69f   :  { %838 = vrot.lane.b32.xlu0 %v1375_v18, %s1307_s16 }
 0x705   :  { %v710_v53 = vpop.permute.xlu1 %709 }
 0x706   :  { %v714_v54 = vmul.f32 %v710_v53, %v1363_v12 }
 0x708   :  { %v717_v55 = vsel %vm716_vm7, %v714_v54, 0.0 }
 0x709   :  { %v718_v56 = vrot.slane %v717_v55, 4  ;;  %v713_v57 = vpop.permute.xlu0 %712 }
 0x70a   :  { %v715_v58 = vmul.f32 %v713_v57, %v1369_v16 }
 0x70b   :  { %v719_v18 = vadd.f32 %v718_v56, %v717_v55 }
 0x70c   :  { %v724_v59 = vsel %vm716_vm7, %v715_v58, 0.0 }
 0x70d   :  { %v720_v60 = vrot.slane %v719_v18, 2  ;;  %v725_v61 = vrot.slane %v724_v59, 4  ;;  %v841_v17 = vpop.permute.xlu0 %840 }
 0x70e   :  { %v846_v20 = vsel %vm136_vm2, %v841_v17, 0 }
 0x70f   :  { %v721_v63 = vadd.f32 %v720_v60, %v719_v18  ;;  %v726_v1 = vadd.f32 %v725_v61, %v724_v59 }
 0x711   :  { %v722_v2 = vrot.slane %v721_v63, 1  ;;  %v727_v3 = vrot.slane %v726_v1, 2  ;;  %v839_v23 = vpop.permute.xlu0 %838 }
 0x713   :  { %v723_v4 = vadd.f32 %v722_v2, %v721_v63  ;;  %v728_v5 = vadd.f32 %v727_v3, %v726_v1 }
 0x715   :  { %v729_v6 = vrot.slane %v728_v5, 1  ;;  %v731_v7 = vpack.c.bf16 %v723_v4, %v723_v4 }
 0x717   :  { %v730_v8 = vadd.f32 %v729_v6, %v728_v5  ;;  %v735_v10 = vunpack.c.l.b16 %v731_v7  ;;  %v960_v7 = vrot.slane %v1457_v51, 4 }
 0x719   :  { %v732_v9 = vpack.c.bf16 %v730_v8, %v730_v8  ;;  %v965_v8 = vsel %vm472_vm3, %v960_v7, 0 }
 0x71b   :  { %v736_v11 = vunpack.c.l.b16 %v732_v9 }
 0x71d   :  { %v737_v13 = vsel %vm462_vm6, %v736_v11, %v735_v10 }
 0x71e   :  { %v738_v15 = vpack.c.b16 %v737_v13, %v737_v13 }
 0x720   :  { %739 = vrot.lane.b32.xlu1 %v738_v15, %s1308_s17 }
 0x724   :  { %790 = vrot.lane.b32.xlu1 %v1367_v14, %s1306_s15 }
 0x728   :  { %788 = vrot.lane.b32.xlu1 %v1367_v14, %s1307_s16 }
 0x792   :  { %v740_v19 = vpop.permute.xlu1 %739 }
 0x793   :  { %1134 = vmatmul.mubr.msk.bf16.vlgmr.msra.gmra.mxu1 %vm136_vm2, %v740_v19 }
 0x794   :  { %1144 = vmatpush3.bf16.xpose.msra.mxu1 %v846_v20  ;;  %1145 = vmatprep.mubr.msk.bf16.mxu1 %vm1298_vm0, %v1297_v0 }
 0x796   :  { %v791_v21 = vpop.permute.xlu1 %790 }
 0x797   :  { %v796_v22 = vsel %vm136_vm2, %v791_v21, 0 }
 0x798   :  { %1138 = vmatpush3.bf16.xpose.msra.mxu0 %v796_v22 }
 0x799   :  { %1149 = vmatprep.subr.bf16.mxu0 %v1297_v0 }
 0x79a   :  { %v789_v14 = vpop.permute.xlu1 %788 }
 0x79b   :  { %1146 = vmatmul.mubr.msk.bf16.vlgmr.msra.gmra.mxu1 %vm136_vm2, %v839_v23 }
 0x79f   :  { %1140 = vmatmul.mubr.msk.bf16.vlgmr.msra.gmra.mxu0 %vm136_vm2, %v789_v14 }
 0x7a0   :  { %1151 = vmatprep.mubr.msk.bf16.mxu0 %vm1298_vm0, %v1297_v0  ;;  %1150 = vmatpush3.bf16.msra.mxu0 %v965_v8 }
 0x853   :  { %v781_v24 = vpop.f32.mrf.mxu1 }
 0x854   :  { %v1480_v25 = vadd.f32 %v781_v24, %v1445_v62 }
 0x855   :  { %v1135_v26 = vpop.f32.mrf.mxu1 }
 0x857   :  { %v784_v27 = vpop.f32.mrf.mxu1 }
 0x859   :  { %v1136_v28 = vpop.f32.mrf.mxu1 }
 0x85b   :  { %v882_v29 = vpop.f32.mrf.mxu1 }
 0x85c   :  { %v891_v30 = vsel %vm136_vm2, %v882_v29, -inf }
 0x85d   :  { %892 = vmax.xlane.f32.xlu0 %v891_v30  ;;  %v1147_v31 = vpop.f32.mrf.mxu1 }
 0x85f   :  { %v832_v32 = vpop.f32.mrf.mxu0  ;;  %v885_v33 = vpop.f32.mrf.mxu1 }
 0x860   :  { %v888_v34 = vsel %vm136_vm2, %v832_v32, -inf }
 0x861   :  { %v1148_v35 = vpop.f32.mrf.mxu1  ;;  %889 = vmax.xlane.f32.xlu1 %v888_v34  ;;  %v1141_v36 = vpop.f32.mrf.mxu0 }
 0x862   :  { %v1047_v35 = vld [vmem:[%s1505_s4] ss:$0 sm:$0xff] }
 0x863   :  { %v835_v0 = vpop.f32.mrf.mxu0 }
 0x865   :  { %v1142_v37 = vpop.f32.mrf.mxu0 }
 0x8e6   :  { %v893_v38 = vpop.xlane.xlu0 %892 }
 0x8e7   :  { %v895_v62 = vsub.f32 %v882_v29, %v893_v38 }
 0x8e9   :  { %v898_v39 = vmul.f32 1.442695, %v895_v62 }
 0x8ea   :  { %v890_v40 = vpop.xlane.xlu1 %889 }
 0x8eb   :  { %1198 = vpow2.f32 %v898_v39  ;;  %v894_v41 = vsub.f32 %v832_v32, %v890_v40 }
 0x8ed   :  { %v896_v42 = vmul.f32 1.442695, %v894_v41 }
 0x8ef   :  { %1200 = vpow2.f32 %v896_v42 }
 0x8f8   :  { %v1199_v43 = vpop.eup %1198 }
 0x8f9   :  { %v903_v44 = vsel %vm136_vm2, %v1199_v43, 0.0 }
 0x8fa   :  { %904 = vadd.xlane.f32.xlu1 %v903_v44 }
 0x8fc   :  { %v1201_v45 = vpop.eup %1200 }
 0x8fd   :  { %v900_v46 = vsel %vm136_vm2, %v1201_v45, 0.0 }
 0x8fe   :  { %901 = vadd.xlane.f32.xlu0 %v900_v46 }
 0x983   :  { %v905_v47 = vpop.xlane.xlu1 %904 }
 0x984   :  { %1202 = vrcp.f32 %v905_v47 }
 0x987   :  { %v902_v48 = vpop.xlane.xlu0 %901 }
 0x988   :  { %1204 = vrcp.f32 %v902_v48 }
 0x991   :  { %v1203_v49 = vpop.eup %1202 }
 0x992   :  { %v909_v50 = vmul.f32 0.125, %v1203_v49 }
 0x994   :  { %v911_v52 = vmul.f32 %v1199_v43, %v909_v50 }
 0x995   :  { %v1205_v53 = vpop.eup %1204 }
 0x996   :  { %v908_v54 = vmul.f32 0.125, %v1205_v53  ;;  %v919_v55 = vsel %vm136_vm2, %v911_v52, 0.0 }
 0x997   :  { %v920_v56 = vrot.slane %v919_v55, 4 }
 0x998   :  { %v910_v57 = vmul.f32 %v1201_v45, %v908_v54 }
 0x999   :  { %v921_v58 = vadd.f32 %v920_v56, %v919_v55 }
 0x99a   :  { %v912_v18 = vsel %vm136_vm2, %v910_v57, 0.0 }
 0x99b   :  { %v922_v59 = vrot.slane %v921_v58, 2  ;;  %v913_v60 = vrot.slane %v912_v18, 4 }
 0x99d   :  { %v923_v61 = vadd.f32 %v922_v59, %v921_v58  ;;  %v914_v63 = vadd.f32 %v913_v60, %v912_v18 }
 0x99f   :  { %v924_v1 = vrot.slane %v923_v61, 1  ;;  %v915_v2 = vrot.slane %v914_v63, 2 }
 0x9a1   :  { %v925_v3 = vadd.f32 %v924_v1, %v923_v61  ;;  %v916_v4 = vadd.f32 %v915_v2, %v914_v63 }
 0x9a3   :  { %930 = vbcast.lane.b32.xlu1 %v925_v3, 256  ;;  %v917_v5 = vrot.slane %v916_v4, 1 }
 0x9a5   :  { %v918_v6 = vadd.f32 %v917_v5, %v916_v4 }
 0x9a7   :  { %927 = vbcast.lane.b32.xlu0 %v918_v6, 256 }
 0xa15   :  { %v931_v9 = vpop.permute.xlu1 %930 }
 0xa16   :  { %v933_v10 = vmul.f32 %v931_v9, %v1369_v16 }
 0xa18   :  { %v942_v11 = vsel %vm934_vm8, %v933_v10, 0.0 }
 0xa19   :  { %v943_v13 = vrot.slane %v942_v11, 4  ;;  %v928_v15 = vpop.permute.xlu0 %927 }
 0xa1a   :  { %v932_v17 = vmul.f32 %v928_v15, %v1363_v12 }
 0xa1b   :  { %v944_v19 = vadd.f32 %v943_v13, %v942_v11 }
 0xa1c   :  { %v935_v20 = vsel %vm934_vm8, %v932_v17, 0.0 }
 0xa1d   :  { %v945_v21 = vrot.slane %v944_v19, 2  ;;  %v936_v22 = vrot.slane %v935_v20, 4 }
 0xa1f   :  { %v946_v23 = vadd.f32 %v945_v21, %v944_v19  ;;  %v937_v14 = vadd.f32 %v936_v22, %v935_v20 }
 0xa21   :  { %v947_v24 = vrot.slane %v946_v23, 1  ;;  %v938_v51 = vrot.slane %v937_v14, 2 }
 0xa23   :  { %v948_v26 = vadd.f32 %v947_v24, %v946_v23  ;;  %v939_v27 = vadd.f32 %v938_v51, %v937_v14 }
 0xa25   :  { %v940_v28 = vrot.slane %v939_v27, 1  ;;  %v950_v29 = vpack.c.bf16 %v948_v26, %v948_v26 }
 0xa27   :  { %v941_v30 = vadd.f32 %v940_v28, %v939_v27  ;;  %v954_v16 = vunpack.c.l.b16 %v950_v29 }
 0xa29   :  { %v949_v31 = vpack.c.bf16 %v941_v30, %v941_v30 }
 0xa2b   :  { %v953_v32 = vunpack.c.l.b16 %v949_v31 }
 0xa2d   :  { %v955_v33 = vsel %vm462_vm6, %v954_v16, %v953_v32 }
 0xa2e   :  { %v956_v34 = vpack.c.b16 %v955_v33, %v955_v33 }
 0xa30   :  { %957 = vrot.lane.b32.xlu1 %v956_v34, %s1309_s18 }
 0xaa2   :  { %v958_v12 = vpop.permute.xlu1 %957 }
 0xaa3   :  { %1152 = vmatmul.mubr.msk.bf16.vlgmr.msra.gmra.mxu0 %vm136_vm2, %v958_v12 }
 0xb63   :  { %v1001_v36 = vpop.f32.mrf.mxu0 }
 0xb64   :  { %v1007_v0 = vadd.f32 %v1001_v36, %v1480_v25 }
 0xb65   :  { %v1153_v37 = vpop.f32.mrf.mxu0 }
 0xb66   :  { %v1014_v38 = vadd.f32 %v1047_v35, %v1007_v0 }
 0xb67   :  { %v1004_v62 = vpop.f32.mrf.mxu0 }
 0xb68   :  { %1016 = vst.msk [vmem:[#allocation8] sm:$0x3] %vm1015_vm9, %v1014_v38 }
 0xb69   :  { %v1154_v39 = vpop.f32.mrf.mxu0 }
 0xb6a   :  { %1277 = shalt.err (!%p1274_p5)
}
 0xb6b   :  { %1026 = dma.vmem_to_hbm [thread:$0]  %s1024_s22, 32, %s1506_s5, [#allocation4]  }
 0xb6c   :  { %1290 = dma.done.wait [#allocation4], 32  }
 0xb6d   :  { %1291 = vsyncadd [#allocation4], 4294967264 }
 0xb6e   :  { %1030 = vsyncpa [#allocation3], 1 }
 0xb6f   :  { %1031 = vsyncpa [#allocation6], 1 }
 0xb70   :  { %1032 = vsyncpa [#allocation4], 1 }

</bundles_post_ra>
